<compile_context>
chip_gen: v7x
topology: tpu7x:2x2x1
jax: 0.10.0
libtpu: 0.0.40
codegen_flags: <defaults>
</compile_context>

<pallas_src>
import math

import jax
import jax.numpy as jnp
from jax import lax
from jax.experimental import pallas as pl
from jax.experimental.pallas import tpu as pltpu


def _round_up(x, m):
    return ((x + m - 1) // m) * m


def make_lsoftmax_forward(margin, in_features, num_classes, beta=100.0, eps=1e-10,
                          mxu_dtype=jnp.bfloat16, tm=512, tn=512, tk=1024,
                          vmem_limit_bytes=None):
    """Builds the train-phase forward of LargeMarginSoftmaxLinear as a Pallas kernel."""
    assert margin >= 1
    # Static coefficients of the cos(m*theta) binomial expansion
    # (analogues of self.C_m_2n / cos_powers / sin2_powers / signs).
    n_terms = margin // 2 + 1
    q = margin // 2
    C_m_2n = [float(math.comb(margin, 2 * n)) for n in range(n_terms)]
    signs = [1.0 if n % 2 == 0 else -1.0 for n in range(n_terms)]
    coeffs = [s * c for s, c in zip(signs, C_m_2n)]
    # Thresholds cos(j*pi/m), j=1..m:  k = floor(acos(clamp(cos)) / (pi/m))
    #                                    = #{ j : clamp(cos) <= cos(j*pi/m) }.
    cos_thresholds = [math.cos(j * math.pi / margin) for j in range(1, margin + 1)]

    beta_eff = max(float(beta), 0.0)
    inv_one_plus_beta = 1.0 / (1.0 + beta_eff)

    def kernel(pred_ref, w_ref, wcn_ref, xn_ref, tgt_ref, out_ref):
        kk = pl.program_id(2)
        nk = pl.num_programs(2)
        # Class-tile index: read here (NOT inside the pl.when body) so no pallas
        # primitive is left inside the cond sub-jaxpr.
        jt = pl.program_id(1)

        @pl.when(kk == 0)
        def _init():
            out_ref[...] = jnp.zeros_like(out_ref)

        # Tiled matmul on the MXU; f32 accumulation directly into the resident
        # f32 output block (same block index for every k -> stays in VMEM).
        out_ref[...] += jnp.dot(pred_ref[...], w_ref[...],
                                preferred_element_type=jnp.float32)

        # All per-row L-Softmax math runs once, on the last K step only.
        @pl.when(kk == nk - 1)
        def _finalize():
            bm, bn = out_ref.shape
            logit = out_ref[...]                                   # (bm, bn) f32

            # One-hot of the target class within this class tile (global ids).
            class_ids = jt * bn + lax.broadcasted_iota(jnp.int32, (bm, bn), 1)
            onehot = class_ids == tgt_ref[...]                     # (bm, bn)

            # Gather logit[i, target[i]] and ||W[:, target[i]]|| for rows whose
            # target falls inside this class tile (zero elsewhere -> masked out).
            logit_target = jnp.sum(jnp.where(onehot, logit, 0.0),
                                   axis=1, keepdims=True)          # (bm, 1)
            w_norm = jnp.sum(jnp.where(onehot, wcn_ref[...], 0.0),
                             axis=1, keepdims=True)                # (bm, 1)
            x_norm = xn_ref[...]                                   # (bm, 1) f32

            wx = w_norm * x_norm
            cos_theta = logit_target / (wx + eps)
            # Guard |cos| > 1 from bf16 matmul noise before the power expansion
            # (identity in exact arithmetic).
            cos_theta = jnp.clip(cos_theta, -1.0, 1.0)

            # cos(m*theta) = sum_n signs[n]*C(m,2n)*cos^(m-2n)*(sin^2)^n,
            # with reused powers (no generic pow).
            c2 = cos_theta * cos_theta
            s2 = 1.0 - c2
            ones = jnp.ones_like(cos_theta)
            cos_pows = [None] * n_terms                  # cos^(m-2n)
            p = cos_theta if (margin % 2 == 1) else ones
            cos_pows[q] = p
            for n in range(q - 1, -1, -1):
                p = p * c2
                cos_pows[n] = p
            sin_pows = [ones]                            # (sin^2)^n
            sp = ones
            for n in range(1, n_terms):
                sp = sp * s2
                sin_pows.append(sp)
            cos_m_theta = coeffs[0] * cos_pows[0]
            for n in range(1, n_terms):
                cos_m_theta = cos_m_theta + coeffs[n] * (cos_pows[n] * sin_pows[n])

            # k staircase without an in-kernel acos.
            cos_c = jnp.clip(cos_theta, -1.0 + eps, 1.0 - eps)
            k_cnt = jnp.zeros_like(cos_theta)
            for thr in cos_thresholds:
                k_cnt = k_cnt + jnp.where(cos_c <= thr, 1.0, 0.0)
            sign_k = 1.0 - 2.0 * jnp.mod(k_cnt, 2.0)     # (-1) ** k

            fyi = wx * (sign_k * cos_m_theta - 2.0 * k_cnt)
            fyi = (fyi + beta_eff * logit_target) * inv_one_plus_beta

            # Scatter fyi back into the target column; everything else keeps the
            # plain logit.  Padded batch rows carry target=0 so their column 0
            # receives fyi — harmless, those rows are sliced away in the wrapper.
            out_ref[...] = jnp.where(onehot, fyi, logit)

    def forward(predict, W, target):
        B, D = predict.shape
        Din, C = W.shape
        assert D == in_features and Din == in_features and C == num_classes

        predict_f32 = predict.astype(jnp.float32)
        W_f32 = W.astype(jnp.float32)
        target_i32 = target.astype(jnp.int32)

        # Hoisted f32 norms (computed once per call, outside the kernel).
        x_norm = jnp.sqrt(jnp.sum(predict_f32 * predict_f32, axis=1, keepdims=True))
        w_col_norm = jnp.sqrt(jnp.sum(W_f32 * W_f32, axis=0, keepdims=True))

        # Tile sizes: sublane-aligned batch tile (big enough to cover the whole
        # batch so W is streamed once), lane-dense (128-multiple) class/K tiles.
        tm_e = min(_round_up(tm, 8), _round_up(B, 8))
        tn_e = min(_round_up(tn, 128), _round_up(C, 128))
        tk_e = min(_round_up(tk, 128), _round_up(D, 128))
        Bp = _round_up(B, tm_e)
        Cp = _round_up(C, tn_e)
        Dp = _round_up(D, tk_e)

        def _pad2(a, rows, cols):
            pr, pc = rows - a.shape[0], cols - a.shape[1]
            if pr == 0 and pc == 0:
                return a
            return jnp.pad(a, ((0, pr), (0, pc)))

        # Cast to the MXU feed dtype BEFORE padding (one copy max, none if aligned).
        pred_p = _pad2(predict.astype(mxu_dtype), Bp, Dp)
        W_p = _pad2(W.astype(mxu_dtype), Dp, Cp)
        wcn_p = _pad2(w_col_norm, 1, Cp)
        xn_p = _pad2(x_norm, Bp, 1)
        tgt_p = _pad2(target_i32.reshape(B, 1), Bp, 1)

        grid = (Bp // tm_e, Cp // tn_e, Dp // tk_e)
        # Note (v7x): if both parallel axes collapse to 1 tile (tiny B and C),
        # only one of the two TensorCores is used; for large C the class axis
        # keeps >=2 tiles and megacore sharding applies.

        itemsize = jnp.dtype(mxu_dtype).itemsize

        # VMEM budget for the chosen tiles: double-buffered operand tiles,
        # the resident f32 output block (+ writeback buffer), small side inputs,
        # and headroom for the finalize temporaries.  Keep <= ~48 MiB on v7x.
        if vmem_limit_bytes is None:
            vmem_needed = (
                2 * (tm_e * tk_e + tk_e * tn_e) * itemsize
                + 2 * tm_e * tn_e * 4
                + 2 * (tn_e + 2 * tm_e) * 4
                + 6 * tm_e * tn_e * 4
            )
            vmem_limit = int(min(max(vmem_needed * 5 // 4, 32 * 1024 * 1024),
                                 96 * 1024 * 1024))
        else:
            vmem_limit = int(vmem_limit_bytes)

        # Actual tiled HBM traffic: predict re-read per class tile, W re-read per
        # batch tile, output written once, small side inputs re-read per tile row.
        n_i, n_j = grid[0], grid[1]
        cost = pl.CostEstimate(
            flops=2 * Bp * Dp * Cp,
            transcendentals=0,
            bytes_accessed=(Bp * Dp * n_j + Dp * Cp * n_i) * itemsize
                           + Bp * Cp * 4
                           + (Cp * n_i + 2 * Bp * n_j) * 4,
        )

        out_p = pl.pallas_call(
            kernel,
            out_shape=jax.ShapeDtypeStruct((Bp, Cp), jnp.float32),
            grid_spec=pltpu.PrefetchScalarGridSpec(
                num_scalar_prefetch=0,
                grid=grid,
                in_specs=[
                    pl.BlockSpec((tm_e, tk_e), lambda i, j, k: (i, k)),   # predict
                    pl.BlockSpec((tk_e, tn_e), lambda i, j, k: (k, j)),   # W
                    pl.BlockSpec((1, tn_e), lambda i, j, k: (0, j)),      # ||W[:,j]||
                    pl.BlockSpec((tm_e, 1), lambda i, j, k: (i, 0)),      # ||x_i||
                    pl.BlockSpec((tm_e, 1), lambda i, j, k: (i, 0)),      # target
                ],
                out_specs=pl.BlockSpec((tm_e, tn_e), lambda i, j, k: (i, j)),
            ),
            compiler_params=pltpu.CompilerParams(
                dimension_semantics=("parallel", "parallel", "arbitrary"),
                vmem_limit_bytes=vmem_limit,
            ),
            cost_estimate=cost,
        )(pred_p, W_p, wcn_p, xn_p, tgt_p)

        return out_p[:B, :C]

    return jax.jit(forward)


def reference_forward(predict, W, target, margin, beta=100.0, eps=1e-10,
                      mxu_dtype=jnp.float32):
    """Pure-JAX reference mirroring the PyTorch module (train phase)."""
    beta = max(float(beta), 0.0)
    logit = jnp.dot(predict.astype(mxu_dtype), W.astype(mxu_dtype),
                    preferred_element_type=jnp.float32)
    B = predict.shape[0]
    idx = jnp.arange(B)
    logit_target = logit[idx, target]
    w_norm = jnp.linalg.norm(W[:, target], axis=0)
    x_norm = jnp.linalg.norm(predict, axis=1)
    cos_theta = logit_target / (w_norm * x_norm + eps)

    n_terms = margin // 2 + 1
    C_m_2n = jnp.array([math.comb(margin, 2 * n) for n in range(n_terms)], jnp.float32)
    cos_p = jnp.array([margin - 2 * n for n in range(n_terms)], jnp.float32)
    sin2_p = jnp.array(list(range(n_terms)), jnp.float32)
    sgn = jnp.array([1.0 if n % 2 == 0 else -1.0 for n in range(n_terms)], jnp.float32)

    sin2 = 1.0 - cos_theta ** 2
    cos_m_theta = jnp.sum(
        sgn[None] * C_m_2n[None]
        * (cos_theta[:, None] ** cos_p[None])
        * (sin2[:, None] ** sin2_p[None]),
        axis=1,
    )
    cos_c = jnp.clip(cos_theta, -1.0 + eps, 1.0 - eps)
    k = jnp.floor(jnp.arccos(cos_c) / (math.pi / margin))
    fyi = w_norm * x_norm * ((-1.0) ** k * cos_m_theta - 2.0 * k)
    fyi = (fyi + beta * logit_target) / (1.0 + beta)
    return logit.at[idx, target].set(fyi)


if __name__ == "__main__":
    B, D, C, margin = 8, 32, 16, 4

    key = jax.random.PRNGKey(0)
    k1, k2, k3 = jax.random.split(key, 3)
    predict = jax.random.normal(k1, (B, D), dtype=jnp.float32)
    W = jax.random.normal(k2, (D, C), dtype=jnp.float32) * (1.0 / math.sqrt(D))
    target = jax.random.randint(k3, (B,), 0, C)

    # Exact-check path (f32 MXU feed) against the pure-JAX reference.
    fwd_f32 = make_lsoftmax_forward(margin, D, C, beta=100.0, mxu_dtype=jnp.float32)
    out_f32 = jax.block_until_ready(fwd_f32(predict, W, target))
    ref_f32 = reference_forward(predict, W, target, margin, beta=100.0)
    assert out_f32.shape == (B, C)
    assert jnp.allclose(out_f32, ref_f32, rtol=2e-3, atol=2e-3), (out_f32, ref_f32)

    # Default path (bf16 MXU feed, f32 accumulation) against a bf16-matmul
    # reference (norms / per-row math stay f32 in both).
    fwd_bf16 = make_lsoftmax_forward(margin, D, C, beta=100.0)
    out_bf16 = jax.block_until_ready(fwd_bf16(predict, W, target))
    ref_bf16 = reference_forward(predict, W, target, margin, beta=100.0,
                                 mxu_dtype=jnp.bfloat16)
    assert out_bf16.shape == (B, C)
    assert bool(jnp.all(jnp.isfinite(out_bf16)))
    assert jnp.allclose(out_bf16, ref_bf16, rtol=5e-2, atol=5e-2), (out_bf16, ref_bf16)

    # Multi-tile smoke test: exercises batch/class/K tiling, zero padding and the
    # class-tile-offset one-hot gather/scatter (grid = (2, 3, 2)).
    B2, D2, C2 = 64, 200, 300
    k4, k5, k6 = jax.random.split(jax.random.PRNGKey(1), 3)
    predict2 = jax.random.normal(k4, (B2, D2), dtype=jnp.float32)
    W2 = jax.random.normal(k5, (D2, C2), dtype=jnp.float32) * (1.0 / math.sqrt(D2))
    target2 = jax.random.randint(k6, (B2,), 0, C2)
    fwd2 = make_lsoftmax_forward(margin, D2, C2, beta=100.0, mxu_dtype=jnp.float32,
                                 tm=32, tn=128, tk=128)
    out2 = jax.block_until_ready(fwd2(predict2, W2, target2))
    ref2 = reference_forward(predict2, W2, target2, margin, beta=100.0)
    assert out2.shape == (B2, C2)
    assert jnp.allclose(out2, ref2, rtol=5e-3, atol=5e-3)

    print("KERNEL_OK")
</pallas_src>

<mosaic_0001>
module attributes {stable_mosaic.version = 11 : i64} {
  func.func @kernel(%arg0: i32, %arg1: i32, %arg2: i32, %arg3: memref<8x128xf32, #tpu.memory_space<vmem>>, %arg4: memref<128x128xf32, #tpu.memory_space<vmem>>, %arg5: memref<1x128xf32, #tpu.memory_space<vmem>>, %arg6: memref<8x1xf32, #tpu.memory_space<vmem>>, %arg7: memref<8x1xi32, #tpu.memory_space<vmem>>, %arg8: memref<8x128xf32, #tpu.memory_space<vmem>>) attributes {dimension_semantics = [#tpu.dimension_semantics<parallel>, #tpu.dimension_semantics<parallel>, #tpu.dimension_semantics<arbitrary>], iteration_bounds = array<i64: 1, 1, 1>, scalar_prefetch = 0 : i64, scratch_operands = 0 : i64, tpu.core_type = #tpu.core_type<tc>, window_params = [{transform_indices = @transform_0, window_bounds = array<i64: 8, 128>}, {transform_indices = @transform_1, window_bounds = array<i64: 128, 128>}, {transform_indices = @transform_2, window_bounds = array<i64: 1, 128>}, {transform_indices = @transform_3, window_bounds = array<i64: 8, 1>}, {transform_indices = @transform_4, window_bounds = array<i64: 8, 1>}, {transform_indices = @transform_5, window_bounds = array<i64: 8, 128>}]} {
    %c0_i32 = arith.constant 0 : i32
    %0 = arith.cmpi eq, %arg2, %c0_i32 : i32
    %1 = arith.extui %0 : i1 to i32
    %c0_i32_0 = arith.constant 0 : i32
    %2 = arith.cmpi ne, %1, %c0_i32_0 : i32
    scf.if %2 {
      %cst_10 = arith.constant 0.000000e+00 : f32
      %12 = vector.broadcast %cst_10 : f32 to vector<8x128xf32>
      %c0_11 = arith.constant 0 : index
      %c0_12 = arith.constant 0 : index
      %13 = vector.load %arg8[%c0_11, %c0_12] : memref<8x128xf32, #tpu.memory_space<vmem>>, vector<8x128xf32>
      tpu.vector_store %arg8[%c0_11, %c0_12], %12 {strides = array<i32>} : memref<8x128xf32, #tpu.memory_space<vmem>>, vector<8x128xf32>,
    } else {
    }
    %c0 = arith.constant 0 : index
    %c0_1 = arith.constant 0 : index
    %3 = vector.load %arg8[%c0, %c0_1] : memref<8x128xf32, #tpu.memory_space<vmem>>, vector<8x128xf32>
    %c0_2 = arith.constant 0 : index
    %c0_3 = arith.constant 0 : index
    %4 = vector.load %arg3[%c0_2, %c0_3] : memref<8x128xf32, #tpu.memory_space<vmem>>, vector<8x128xf32>
    %c0_4 = arith.constant 0 : index
    %c0_5 = arith.constant 0 : index
    %5 = vector.load %arg4[%c0_4, %c0_5] : memref<128x128xf32, #tpu.memory_space<vmem>>, vector<128x128xf32>
    %cst = arith.constant dense<0.000000e+00> : vector<8x128xf32>
    %6 = tpu.matmul %4, %5, %cst {dimension_numbers = #tpu.dot_dimension_numbers<[1], [0], [0], [1], [0, 0, 1, 1], [], []>} : vector<8x128xf32>, vector<128x128xf32>, vector<8x128xf32> -> vector<8x128xf32>
    %7 = arith.addf %3, %6 : vector<8x128xf32>
    %c0_6 = arith.constant 0 : index
    %c0_7 = arith.constant 0 : index
    %8 = vector.load %arg8[%c0_6, %c0_7] : memref<8x128xf32, #tpu.memory_space<vmem>>, vector<8x128xf32>
    tpu.vector_store %arg8[%c0_6, %c0_7], %7 {strides = array<i32>} : memref<8x128xf32, #tpu.memory_space<vmem>>, vector<8x128xf32>,
    %c0_i32_8 = arith.constant 0 : i32
    %9 = arith.cmpi eq, %arg2, %c0_i32_8 : i32
    %10 = arith.extui %9 : i1 to i32
    %c0_i32_9 = arith.constant 0 : i32
    %11 = arith.cmpi ne, %10, %c0_i32_9 : i32
    scf.if %11 {
      %c0_10 = arith.constant 0 : index
      %c0_11 = arith.constant 0 : index
      %12 = vector.load %arg8[%c0_10, %c0_11] : memref<8x128xf32, #tpu.memory_space<vmem>>, vector<8x128xf32>
      %c128_i32 = arith.constant 128 : i32
      %13 = arith.muli %arg1, %c128_i32 : i32
      %14 = tpu.iota {dimensions = array<i32: 1>} : vector<8x128xi32>
      %15 = vector.broadcast %13 : i32 to vector<8x128xi32>
      %16 = arith.addi %15, %14 : vector<8x128xi32>
      %c0_12 = arith.constant 0 : index
      %c0_13 = arith.constant 0 : index
      %17 = vector.load %arg7[%c0_12, %c0_13] : memref<8x1xi32, #tpu.memory_space<vmem>>, vector<8x1xi32>
      %18 = vector.broadcast %17 : vector<8x1xi32> to vector<8x128xi32>
      %19 = arith.cmpi eq, %16, %18 : vector<8x128xi32>
      %cst_14 = arith.constant 0.000000e+00 : f32
      %20 = vector.broadcast %cst_14 : f32 to vector<8x128xf32>
      %21 = arith.select %19, %12, %20 : vector<8x128xi1>, vector<8x128xf32>
      %cst_15 = arith.constant dense<0.000000e+00> : vector<8xf32>
      %22 = vector.multi_reduction <add>, %21, %cst_15 [1] : vector<8x128xf32> to vector<8xf32>
      %23 = vector.shape_cast %22 : vector<8xf32> to vector<8x1xf32>
      %c0_16 = arith.constant 0 : index
      %c0_17 = arith.constant 0 : index
      %24 = vector.load %arg5[%c0_16, %c0_17] : memref<1x128xf32, #tpu.memory_space<vmem>>, vector<1x128xf32>
      %cst_18 = arith.constant 0.000000e+00 : f32
      %25 = vector.shape_cast %24 : vector<1x128xf32> to vector<1x128xf32>
      %26 = vector.broadcast %25 : vector<1x128xf32> to vector<8x128xf32>
      %27 = vector.broadcast %cst_18 : f32 to vector<8x128xf32>
      %28 = arith.select %19, %26, %27 : vector<8x128xi1>, vector<8x128xf32>
      %cst_19 = arith.constant dense<0.000000e+00> : vector<8xf32>
      %29 = vector.multi_reduction <add>, %28, %cst_19 [1] : vector<8x128xf32> to vector<8xf32>
      %30 = vector.shape_cast %29 : vector<8xf32> to vector<8x1xf32>
      %c0_20 = arith.constant 0 : index
      %c0_21 = arith.constant 0 : index
      %31 = vector.load %arg6[%c0_20, %c0_21] : memref<8x1xf32, #tpu.memory_space<vmem>>, vector<8x1xf32>
      %32 = arith.mulf %30, %31 : vector<8x1xf32>
      %cst_22 = arith.constant 1.000000e-10 : f32
      %33 = vector.broadcast %cst_22 : f32 to vector<8x1xf32>
      %34 = arith.addf %32, %33 : vector<8x1xf32>
      %35 = arith.divf %23, %34 : vector<8x1xf32>
      %cst_23 = arith.constant -1.000000e+00 : f32
      %cst_24 = arith.constant 1.000000e+00 : f32
      %36 = vector.broadcast %cst_23 : f32 to vector<8x1xf32>
      %37 = arith.maximumf %36, %35 : vector<8x1xf32>
      %38 = vector.broadcast %cst_24 : f32 to vector<8x1xf32>
      %39 = arith.minimumf %38, %37 : vector<8x1xf32>
      %40 = arith.mulf %39, %39 : vector<8x1xf32>
      %cst_25 = arith.constant 1.000000e+00 : f32
      %41 = vector.broadcast %cst_25 : f32 to vector<8x1xf32>
      %42 = arith.subf %41, %40 : vector<8x1xf32>
      %cst_26 = arith.constant 1.000000e+00 : f32
      %43 = vector.broadcast %cst_26 : f32 to vector<8x1xf32>
      %44 = arith.mulf %43, %40 : vector<8x1xf32>
      %45 = arith.mulf %44, %40 : vector<8x1xf32>
      %46 = arith.mulf %43, %42 : vector<8x1xf32>
      %47 = arith.mulf %46, %42 : vector<8x1xf32>
      %cst_27 = arith.constant 1.000000e+00 : f32
      %48 = vector.broadcast %cst_27 : f32 to vector<8x1xf32>
      %49 = arith.mulf %48, %45 : vector<8x1xf32>
      %50 = arith.mulf %44, %46 : vector<8x1xf32>
      %cst_28 = arith.constant -6.000000e+00 : f32
      %51 = vector.broadcast %cst_28 : f32 to vector<8x1xf32>
      %52 = arith.mulf %51, %50 : vector<8x1xf32>
      %53 = arith.addf %49, %52 : vector<8x1xf32>
      %54 = arith.mulf %43, %47 : vector<8x1xf32>
      %cst_29 = arith.constant 1.000000e+00 : f32
      %55 = vector.broadcast %cst_29 : f32 to vector<8x1xf32>
      %56 = arith.mulf %55, %54 : vector<8x1xf32>
      %57 = arith.addf %53, %56 : vector<8x1xf32>
      %cst_30 = arith.constant -1.000000e+00 : f32
      %cst_31 = arith.constant 1.000000e+00 : f32
      %58 = vector.broadcast %cst_30 : f32 to vector<8x1xf32>
      %59 = arith.maximumf %58, %39 : vector<8x1xf32>
      %60 = vector.broadcast %cst_31 : f32 to vector<8x1xf32>
      %61 = arith.minimumf %60, %59 : vector<8x1xf32>
      %cst_32 = arith.constant 0.000000e+00 : f32
      %62 = vector.broadcast %cst_32 : f32 to vector<8x1xf32>
      %cst_33 = arith.constant 0.707106769 : f32
      %63 = vector.broadcast %cst_33 : f32 to vector<8x1xf32>
      %64 = arith.cmpf ole, %61, %63 : vector<8x1xf32>
      %cst_34 = arith.constant 1.000000e+00 : f32
      %cst_35 = arith.constant 0.000000e+00 : f32
      %65 = vector.broadcast %cst_34 : f32 to vector<8x1xf32>
      %66 = vector.broadcast %cst_35 : f32 to vector<8x1xf32>
      %67 = arith.select %64, %65, %66 : vector<8x1xi1>, vector<8x1xf32>
      %68 = arith.addf %62, %67 : vector<8x1xf32>
      %cst_36 = arith.constant 6.12323426E-17 : f32
      %69 = vector.broadcast %cst_36 : f32 to vector<8x1xf32>
      %70 = arith.cmpf ole, %61, %69 : vector<8x1xf32>
      %cst_37 = arith.constant 1.000000e+00 : f32
      %cst_38 = arith.constant 0.000000e+00 : f32
      %71 = vector.broadcast %cst_37 : f32 to vector<8x1xf32>
      %72 = vector.broadcast %cst_38 : f32 to vector<8x1xf32>
      %73 = arith.select %70, %71, %72 : vector<8x1xi1>, vector<8x1xf32>
      %74 = arith.addf %68, %73 : vector<8x1xf32>
      %cst_39 = arith.constant -0.707106769 : f32
      %75 = vector.broadcast %cst_39 : f32 to vector<8x1xf32>
      %76 = arith.cmpf ole, %61, %75 : vector<8x1xf32>
      %cst_40 = arith.constant 1.000000e+00 : f32
      %cst_41 = arith.constant 0.000000e+00 : f32
      %77 = vector.broadcast %cst_40 : f32 to vector<8x1xf32>
      %78 = vector.broadcast %cst_41 : f32 to vector<8x1xf32>
      %79 = arith.select %76, %77, %78 : vector<8x1xi1>, vector<8x1xf32>
      %80 = arith.addf %74, %79 : vector<8x1xf32>
      %cst_42 = arith.constant -1.000000e+00 : f32
      %81 = vector.broadcast %cst_42 : f32 to vector<8x1xf32>
      %82 = arith.cmpf ole, %61, %81 : vector<8x1xf32>
      %cst_43 = arith.constant 1.000000e+00 : f32
      %cst_44 = arith.constant 0.000000e+00 : f32
      %83 = vector.broadcast %cst_43 : f32 to vector<8x1xf32>
      %84 = vector.broadcast %cst_44 : f32 to vector<8x1xf32>
      %85 = arith.select %82, %83, %84 : vector<8x1xi1>, vector<8x1xf32>
      %86 = arith.addf %80, %85 : vector<8x1xf32>
      %cst_45 = arith.constant 2.000000e+00 : f32
      %87 = vector.broadcast %cst_45 : f32 to vector<8x1xf32>
      %88 = arith.remf %86, %87 : vector<8x1xf32>
      %cst_46 = arith.constant 0.000000e+00 : f32
      %89 = vector.broadcast %cst_46 : f32 to vector<8x1xf32>
      %90 = arith.cmpf one, %88, %89 : vector<8x1xf32>
      %cst_47 = arith.constant 0.000000e+00 : f32
      %91 = vector.broadcast %cst_47 : f32 to vector<8x1xf32>
      %92 = arith.cmpf olt, %88, %91 : vector<8x1xf32>
      %cst_48 = arith.constant 0.000000e+00 : f32
      %93 = arith.cmpf olt, %cst_45, %cst_48 : f32
      %94 = vector.broadcast %93 : i1 to vector<8x1xi1>
      %95 = vector.broadcast %94 : vector<8x1xi1> to vector<8x1xi1>
      %96 = arith.xori %92, %95 : vector<8x1xi1>
      %97 = arith.andi %96, %90 : vector<8x1xi1>
      %98 = vector.broadcast %cst_45 : f32 to vector<8x1xf32>
      %99 = arith.addf %88, %98 : vector<8x1xf32>
      %100 = arith.select %97, %99, %88 : vector<8x1xi1>, vector<8x1xf32>
      %cst_49 = arith.constant 2.000000e+00 : f32
      %101 = vector.broadcast %cst_49 : f32 to vector<8x1xf32>
      %102 = arith.mulf %101, %100 : vector<8x1xf32>
      %cst_50 = arith.constant 1.000000e+00 : f32
      %103 = vector.broadcast %cst_50 : f32 to vector<8x1xf32>
      %104 = arith.subf %103, %102 : vector<8x1xf32>
      %105 = arith.mulf %104, %57 : vector<8x1xf32>
      %cst_51 = arith.constant 2.000000e+00 : f32
      %106 = vector.broadcast %cst_51 : f32 to vector<8x1xf32>
      %107 = arith.mulf %106, %86 : vector<8x1xf32>
      %108 = arith.subf %105, %107 : vector<8x1xf32>
      %109 = arith.mulf %32, %108 : vector<8x1xf32>
      %cst_52 = arith.constant 1.000000e+02 : f32
      %110 = vector.broadcast %cst_52 : f32 to vector<8x1xf32>
      %111 = arith.mulf %110, %23 : vector<8x1xf32>
      %112 = arith.addf %109, %111 : vector<8x1xf32>
      %cst_53 = arith.constant 9.900990e-03 : f32
      %113 = vector.broadcast %cst_53 : f32 to vector<8x1xf32>
      %114 = arith.mulf %112, %113 : vector<8x1xf32>
      %115 = vector.shape_cast %114 : vector<8x1xf32> to vector<8x1xf32>
      %116 = vector.broadcast %115 : vector<8x1xf32> to vector<8x128xf32>
      %117 = arith.select %19, %116, %12 : vector<8x128xi1>, vector<8x128xf32>
      %c0_54 = arith.constant 0 : index
      %c0_55 = arith.constant 0 : index
      %118 = vector.load %arg8[%c0_54, %c0_55] : memref<8x128xf32, #tpu.memory_space<vmem>>, vector<8x128xf32>
      tpu.vector_store %arg8[%c0_54, %c0_55], %117 {strides = array<i32>} : memref<8x128xf32, #tpu.memory_space<vmem>>, vector<8x128xf32>,
    } else {
    }
    return
  }
  func.func @transform_0(%arg0: i32, %arg1: i32, %arg2: i32) -> (i32, i32) {
    %c0_i32 = arith.constant 0 : i32
    return %arg0, %arg2 : i32, i32
  }
  func.func @transform_1(%arg0: i32, %arg1: i32, %arg2: i32) -> (i32, i32) {
    %c0_i32 = arith.constant 0 : i32
    return %arg2, %arg1 : i32, i32
  }
  func.func @transform_2(%arg0: i32, %arg1: i32, %arg2: i32) -> (i32, i32) {
    %c0_i32 = arith.constant 0 : i32
    %c0_i32_0 = arith.constant 0 : i32
    return %c0_i32, %arg1 : i32, i32
  }
  func.func @transform_3(%arg0: i32, %arg1: i32, %arg2: i32) -> (i32, i32) {
    %c0_i32 = arith.constant 0 : i32
    %c0_i32_0 = arith.constant 0 : i32
    return %arg0, %c0_i32 : i32, i32
  }
  func.func @transform_4(%arg0: i32, %arg1: i32, %arg2: i32) -> (i32, i32) {
    %c0_i32 = arith.constant 0 : i32
    %c0_i32_0 = arith.constant 0 : i32
    return %arg0, %c0_i32 : i32, i32
  }
  func.func @transform_5(%arg0: i32, %arg1: i32, %arg2: i32) -> (i32, i32) {
    %c0_i32 = arith.constant 0 : i32
    return %arg0, %arg1 : i32, i32
  }
}

</mosaic_0001>

<bundles_post_ra>
// kernel: forward.1
= control target key start
LH: loop header
LB: loop body
LE: loop exit
PB: predicated region body
PF: predicated region fallthrough
CT: control target
= control target key end

     0   :  { %v329_v3 = vmov 0.0|0.0   ;;  %vm330_vm0 = vmmov 0   ;;  %v331_v6 = vmov 0.0   ;;  %v332_v7 = vmov 0   ;;  %s456_s0 = inlined_call_operand.vmem [shape: f32[8,128], index: 0, kind: input, shape index: {}]   ;;  %s457_s1 = inlined_call_operand.vmem [shape: f32[128,128], index: 1, kind: input, shape index: {}]   ;;  %s458_s2 = inlined_call_operand.vmem [shape: f32[1,128], index: 2, kind: input, shape index: {}]   ;;  %s459_s3 = inlined_call_operand.vmem [shape: f32[8,1], index: 3, kind: input, shape index: {}]   ;;  %s460_s4 = inlined_call_operand.vmem [shape: s32[8,1], index: 4, kind: input, shape index: {}]   ;;  %s461_s5 = inlined_call_operand.hbm [shape: f32[8,128], index: 5, kind: output, shape index: {}]  }
   0x1   :  { %v28_v0 = vld [vmem:[%s457_s1] sm:$0xff]  ;;  %v29_v1 = vld [vmem:[%s457_s1 + $0x8] sm:$0xff]  ;;  %v30_v2 = vld [vmem:[%s457_s1 + $0x10] sm:$0xff]  ;;  %272 = vmatprep.subr.bf16.mxu0 %v329_v3  ;;  %269 = vmatprep.mubr.msk.f32.mxu0 %vm330_vm0, %v331_v6 }
   0x2   :  { %v273_v4 = vpack.c.bf16 %v29_v1, %v28_v0  ;;  %v31_v5 = vld [vmem:[%s457_s1 + $0x18] sm:$0xff]  ;;  %301 = vset.pattern.permute.xlu0 %v332_v7  ;;  %302 = vset.pattern.permute.xlu1 %v332_v7  ;;  %v32_v9 = vld [vmem:[%s457_s1 + $0x20] sm:$0xff]  ;;  %v33_v10 = vld [vmem:[%s457_s1 + $0x28] sm:$0xff] }
   0x3   :  { %v276_v8 = vpack.c.bf16 %v31_v5, %v30_v2  ;;  %v125_v11 = vld [vmem:[%s460_s4] sm:$0xff] }
   0x4   :  { %274 = vmatpush3.bf16.msra.mxu0 %v273_v4  ;;  %127 = vperm.xlu0 %301, %v125_v11  }
   0x5   :  { %275 = vmatprep.subr.bf16.mxu0 %v329_v3 }
   0x6   :  { %10 = vsyncpa [#allocation3], 0  ;;  %v279_v12 = vpack.c.bf16 %v33_v10, %v32_v9  ;;  %v34_v13 = vld [vmem:[%s457_s1 + $0x30] sm:$0xff]  ;;  %v35_v14 = vld [vmem:[%s457_s1 + $0x38] sm:$0xff]  ;;  %v121_v29 = vlaneseq }
   0x7   :  { %v282_v15 = vpack.c.bf16 %v35_v14, %v34_v13  ;;  %v36_v16 = vld [vmem:[%s457_s1 + $0x40] sm:$0xff]  ;;  %v37_v17 = vld [vmem:[%s457_s1 + $0x48] sm:$0xff]  ;;  %v38_v19 = vld [vmem:[%s457_s1 + $0x50] sm:$0xff] }
   0x8   :  { %277 = vmatpush3.bf16.msra.mxu0 %v276_v8  ;;  %v285_v18 = vpack.c.bf16 %v37_v17, %v36_v16  ;;  %v39_v20 = vld [vmem:[%s457_s1 + $0x58] sm:$0xff]  ;;  %v40_v22 = vld [vmem:[%s457_s1 + $0x60] sm:$0xff]  ;;  %v41_v23 = vld [vmem:[%s457_s1 + $0x68] sm:$0xff]  ;;  %v419_v30 = vand.u32 127, %v121_v29 }
   0x9   :  { %278 = vmatprep.subr.bf16.mxu0 %v329_v3  ;;  %v288_v21 = vpack.c.bf16 %v39_v20, %v38_v19  ;;  %v291_v24 = vpack.c.bf16 %v41_v23, %v40_v22  ;;  %v42_v25 = vld [vmem:[%s457_s1 + $0x70] sm:$0xff]  ;;  %v43_v26 = vld [vmem:[%s457_s1 + $0x78] sm:$0xff]  ;;  %v27_v28 = vld [vmem:[%s456_s0] sm:$0xff] }
   0xa   :  { %v294_v27 = vpack.c.bf16 %v43_v26, %v42_v25  ;;  %v218_v31 = vld [vmem:[%s458_s2] ss:$0 sm:$0xff]  ;;  %s333_s2 = smov [#allocation2]  }
   0xb   :  { %v143_v37 = vld [vmem:[%s459_s3] sm:$0xff]  ;;  %s210_s3 = sshll.u32 %s333_s2, 4  ;;  %s211_s3 = int_to_ptr.vmem [resolvable:$true] %s210_s3 }
   0xc   :  { %280 = vmatpush3.bf16.msra.mxu0 %v279_v12  ;;  %s305_s30 = scalar_lea.vmem %s211_s3, 128  ;;  %p310_p1 = scmp.lt.s32.totalorder %s211_s3, %s211_s3 }
   0xd   :  { %281 = vmatprep.subr.bf16.mxu0 %v329_v3  ;;  %p306_p0 = scmp.ne.s32.totalorder %s211_s3, %s305_s30  ;;  %p311_p2 = scmp.lt.s32.totalorder %s305_s30, %s305_s30 }
   0xf   :  { %p312_p3 = por %p311_p2, %p310_p1 }
  0x10   :  { %283 = vmatpush3.bf16.msra.mxu0 %v282_v15 }
  0x11   :  { %284 = vmatprep.subr.bf16.mxu0 %v329_v3  ;;  %p313_p4 = pnand %p312_p3, %p306_p0 }
  0x14   :  { %286 = vmatpush3.bf16.msra.mxu0 %v285_v18 }
  0x15   :  { %287 = vmatprep.subr.bf16.mxu0 %v329_v3 }
  0x18   :  { %289 = vmatpush3.bf16.msra.mxu0 %v288_v21 }
  0x19   :  { %290 = vmatprep.subr.bf16.mxu0 %v329_v3 }
  0x1c   :  { %292 = vmatpush3.bf16.msra.mxu0 %v291_v24 }
  0x1d   :  { %293 = vmatprep.subr.bf16.mxu0 %v329_v3 }
  0x20   :  { %295 = vmatpush3.bf16.msra.mxu0 %v294_v27 }
  0x23   :  { %270 = vmatmul.mubr.f32.vlgmr.msra.gmra.mrb[0].mxu0 %v27_v28 }
  0x83   :  { %v424_v32 = vpop.permute.xlu0 %127 }
  0x84   :  { %vm129_vm1 = vcmp.eq.s32.totalorder %v419_v30, %v424_v32 }
  0x85   :  { %v140_v33 = vsel %vm129_vm1, %v218_v31, 0.0 }
  0x86   :  { %141 = vadd.xlane.f32.xlu0 %v140_v33 }
  0xf6   :  { %v110_v34 = vpop.f32.mrb[0].mxu0 }
  0xf7   :  { %v271_v35 = vpop.f32.mrb[1].mxu0  ;;  %v130_v36 = vsel %vm129_vm1, %v110_v34, 0.0 }
  0xf8   :  { %131 = vadd.xlane.f32.xlu1 %v130_v36 }
 0x113   :  { %v142_v38 = vpop.xlane.xlu0 %141 }
 0x114   :  { %v144_v39 = vmul.f32 %v143_v37, %v142_v38 }
 0x116   :  { %v145_v40 = vadd.f32 1e-10, %v144_v39 }
 0x118   :  { %303 = vrcp.f32 %v145_v40 }
 0x122   :  { %v304_v41 = vpop.eup %303 }
 0x185   :  { %v132_v42 = vpop.xlane.xlu1 %131 }
 0x186   :  { %v147_v43 = vmul.f32 %v304_v41, %v132_v42  ;;  %v194_v13 = vmul.f32 100.0, %v132_v42 }
 0x188   :  { %v219_v44 = vclamps-f32 %v147_v43, 1.0 }
 0x18a   :  { %vm160_vm2 = vcmp.le.f32.partialorder %v219_v44, 0.70710677  ;;  %vm163_vm3 = vcmp.le.f32.partialorder %v219_v44, 6.123234e-17  ;;  %vm166_vm4 = vcmp.le.f32.partialorder %v219_v44, -0.70710677  ;;  %v150_v53 = vmul.f32 %v219_v44, %v219_v44 }
 0x18b   :  { %v161_v45 = vsel %vm160_vm2, 1.0, %v331_v6  ;;  %v164_v46 = vsel %vm163_vm3, 1.0, %v331_v6  ;;  %vm169_vm5 = vcmp.le.f32.partialorder %v219_v44, -1.0  ;;  %v167_v48 = vsel %vm166_vm4, 1.0, %v331_v6 }
 0x18c   :  { %v165_v47 = vadd.f32 %v164_v46, %v161_v45  ;;  %v170_v50 = vsel %vm169_vm5, 1.0, %v331_v6  ;;  %v151_v56 = vsub.f32 1.0, %v150_v53  ;;  %v152_v1 = vmul.f32 %v150_v53, %v150_v53 }
 0x18e   :  { %v168_v49 = vadd.f32 %v167_v48, %v165_v47  ;;  %v154_v59 = vmul.f32 %v151_v56, %v150_v53  ;;  %v153_v5 = vmul.f32 %v151_v56, %v151_v56 }
 0x190   :  { %v171_v51 = vadd.f32 %v170_v50, %v168_v49  ;;  %v155_v63 = vmul.f32 -6.0, %v154_v59 }
 0x192   :  { %v172_v52 = vand.u32 2147483647, %v171_v51  ;;  %v181_v62 = vand.u32 2147483648, %v171_v51  ;;  %v156_v3 = vadd.f32 %v155_v63, %v152_v1  ;;  %v191_v10 = vmul.f32 2.0, %v171_v51 }
 0x194   :  { %v174_v54 = vmul.f32 0.5, %v172_v52  ;;  %v157_v7 = vadd.f32 %v156_v3, %v153_v5 }
 0x196   :  { %v175_v55 = vfloor.f32 %v174_v54 }
 0x198   :  { %v176_v57 = vmul.f32 2.0, %v175_v55 }
 0x19a   :  { %v177_v58 = vsub.f32 %v172_v52, %v176_v57 }
 0x19c   :  { %vm178_vm6 = vcmp.eq.f32.partialorder %v177_v58, 2.0 }
 0x19d   :  { %v179_v60 = vsel %vm178_vm6, 0.0, %v177_v58 }
 0x19e   :  { %v180_v61 = vand.u32 2147483647, %v179_v60 }
 0x1a0   :  { %v182_v0 = vor.u32 %v181_v62, %v180_v61 }
 0x1a2   :  { %vm183_vm7 = vcmp.ne.f32.partialorder %v182_v0, 0.0  ;;  %vm184_vm8 = vcmp.lt.f32.partialorder %v182_v0, 0.0  ;;  %v186_v2 = vadd.f32 2.0, %v182_v0 }
 0x1a3   :  { %vm185_vm9 = vmand %vm184_vm8, %vm183_vm7 }
 0x1a4   :  { %v187_v4 = vsel %vm185_vm9, %v186_v2, %v182_v0 }
 0x1a5   :  { %v188_v6 = vmul.f32 2.0, %v187_v4 }
 0x1a7   :  { %v189_v8 = vsub.f32 1.0, %v188_v6 }
 0x1a9   :  { %v190_v9 = vmul.f32 %v189_v8, %v157_v7 }
 0x1ab   :  { %v192_v11 = vsub.f32 %v190_v9, %v191_v10 }
 0x1ad   :  { %v193_v12 = vmul.f32 %v192_v11, %v144_v39 }
 0x1af   :  { %v195_v14 = vadd.f32 %v194_v13, %v193_v12 }
 0x1b1   :  { %v196_v15 = vmul.f32 0.00990099, %v195_v14 }
 0x1b3   :  { %199 = vperm.xlu1 %302, %v196_v15  }
 0x232   :  { %v200_v16 = vpop.permute.xlu1 %199 }
 0x233   :  { %v202_v17 = vsel %vm129_vm1, %v200_v16, %v110_v34 }
 0x234   :  { %203 = vst [vmem:[#allocation2] sm:$0xff] %v202_v17 }
 0x235   :  { %316 = shalt.err (!%p313_p4)
}
 0x236   :  { %s317_s8 = scalar_lea.hbm %s461_s5, 128 }
 0x237   :  { %p318_p5 = scmp.ne.s32.totalorder %s461_s5, %s317_s8  ;;  %p321_p6 = scmp.lt.u32.totalorder %s317_s8, %s461_s5 }
 0x239   :  { %p323_p7 = pnand %p321_p6, %p318_p5 }
 0x23b   :  { %326 = shalt.err (!%p323_p7)
}
 0x23c   :  { %213 = dma.vmem_to_hbm [thread:$0]  %s211_s3, 128, %s461_s5, [#allocation3]  }
 0x23d   :  { %327 = dma.done.wait [#allocation3], 128  }
 0x23e   :  { %328 = vsyncadd [#allocation3], 4294967168 }
 0x23f   :  { %217 = vsyncpa [#allocation3], 1 }

</bundles_post_ra>
